<compile_context>
chip_gen: v7x
topology: tpu7x:2x2x1
jax: 0.10.0
libtpu: 0.0.40
codegen_flags: <defaults>
</compile_context>

<pallas_src>
import functools

import jax
import jax.numpy as jnp
from jax.experimental import pallas as pl
from jax.experimental.pallas import tpu as pltpu

N_IN = 3
N_OUT = 10
N_HIDDEN = 10           # total hidden Linear+BN layers across both blocks
N_HIDDEN_SIZE = 128
NSKIP = N_HIDDEN // 2   # 5 layers per residual block
OUT_W = 16              # N_OUT padded to 16 output lanes
EPS = 1e-5


def _round_up(n, m):
    return ((n + m - 1) // m) * m


def _mxu_is_256_wide():
    """Pack two batch rows per kernel row only on 256x256-MXU chips (v6e/v7x)."""
    try:
        kind = jax.devices()[0].device_kind.lower()
    except Exception:
        return False
    return not any(t in kind for t in ("v2", "v3", "v4", "v5"))


# ---------------------------------------------------------------------------
# Pallas kernel: full forward for one (TILE_B, F) batch tile.
# Works for both the plain (F=128, n_in=3, out=16) and lane-packed
# (F=256, n_in=6, out=32) layouts -- all sizes come from the ref shapes.
# ---------------------------------------------------------------------------
def mlp_skip_kernel(x_ref, w_in_ref, b_in_ref, w_hid_ref, b_hid_ref,
                    w_out_ref, b_out_ref, o_ref, *, compute_dtype):
    # Input layer: Linear(n_in -> F) + folded BN + ReLU as rank-1 broadcast
    # multiply-adds on the VPU (no wasted zero-padded MXU matmul).
    x = x_ref[...]                       # (tb, n_in)  f32
    w_in = w_in_ref[...]                 # (n_in, F)   f32
    n_in = w_in_ref.shape[0]
    h = b_in_ref[...]                    # (1, F), broadcasts up on first add
    for j in range(n_in):
        h = h + x[:, j:j + 1] * w_in[j:j + 1, :]
    h = jnp.maximum(h, 0.0)

    # Two residual blocks of NSKIP x (Linear+BN): ReLU between layers,
    # block output = ReLU(last_layer_out + block_input).
    n_hid = w_hid_ref.shape[0]
    nskip = n_hid // 2
    skip = h
    for l in range(n_hid):
        z = jnp.dot(h.astype(compute_dtype), w_hid_ref[l],
                    preferred_element_type=jnp.float32) + b_hid_ref[l]
        if l == nskip - 1 or l == n_hid - 1:     # end of a residual block
            h = jnp.maximum(z + skip, 0.0)
            skip = h
        else:
            h = jnp.maximum(z, 0.0)

    # Output layer: Linear(F -> OUT_W) (OUT_W = 16, or 2x16 lane-packed).
    o = jnp.dot(h.astype(compute_dtype), w_out_ref[...],
                preferred_element_type=jnp.float32)
    o_ref[...] = o + b_out_ref[...]


# ---------------------------------------------------------------------------
# BN folding (eval mode) -- plain JAX glue.
# ---------------------------------------------------------------------------
def fold_bn(w, b, gamma, beta, mean, var):
    """Fold eval-mode BatchNorm1d into a Linear.  w: (F_in, F_out)."""
    s = gamma / jnp.sqrt(var + EPS)
    return w * s[None, :], (b - mean) * s + beta


# ---------------------------------------------------------------------------
# Wrapper: fold/pack params, set up batch grid, call the kernel.
# ---------------------------------------------------------------------------
@functools.partial(jax.jit, static_argnames=("compute_dtype", "tile_b", "pack"))
def three_body_mlp_skip(x, params, *, compute_dtype=jnp.bfloat16,
                        tile_b=1024, pack=None):
    if pack is None:
        pack = _mxu_is_256_wide()
    P = 2 if pack else 1
    B = x.shape[0]
    F = N_HIDDEN_SIZE
    Fk = P * F
    n_in_k = P * N_IN
    outw_k = P * OUT_W

    # --- fold eval-mode BN into every Linear that is followed by a BN ---
    w_in, b_in = fold_bn(params["w_in"], params["b_in"],
                         params["g_in"], params["be_in"],
                         params["m_in"], params["v_in"])
    s_hid = params["g_hid"] / jnp.sqrt(params["v_hid"] + EPS)        # (10, F)
    w_hid = params["w_hid"] * s_hid[:, None, :]                      # (10, F, F)
    b_hid = (params["b_hid"] - params["m_hid"]) * s_hid + params["be_hid"]

    # Output Linear, padded to 16 lanes (no BN after it).
    w_out = jnp.zeros((F, OUT_W), jnp.float32).at[:, :N_OUT].set(params["w_out"])
    b_out = jnp.zeros((1, OUT_W), jnp.float32).at[0, :N_OUT].set(params["b_out"])

    if pack:
        # Two batch rows per kernel row: block-diagonal weights keep the two
        # rows independent while filling a 256-wide MXU.
        zero = jnp.zeros_like(w_hid)
        w_hid = jnp.concatenate(
            [jnp.concatenate([w_hid, zero], axis=2),
             jnp.concatenate([zero, w_hid], axis=2)], axis=1)        # (10,2F,2F)
        b_hid = jnp.concatenate([b_hid, b_hid], axis=-1)             # (10, 2F)
        w_in_p = jnp.zeros((n_in_k, Fk), jnp.float32)
        w_in = w_in_p.at[:N_IN, :F].set(w_in).at[N_IN:, F:].set(w_in)
        b_in = jnp.concatenate([b_in, b_in], axis=-1)                # (2F,)
        w_out_p = jnp.zeros((Fk, outw_k), jnp.float32)
        w_out = w_out_p.at[:F, :OUT_W].set(w_out).at[F:, OUT_W:].set(w_out)
        b_out = jnp.concatenate([b_out, b_out], axis=-1)             # (1, 2*OUT_W)

    # --- dtype / layout prep ---
    w_hid = w_hid.astype(compute_dtype)                 # MXU operands
    b_hid = b_hid[:, None, :].astype(jnp.float32)       # (10, 1, Fk)
    w_out = w_out.astype(compute_dtype)
    w_in = w_in.astype(jnp.float32)                     # VPU path stays f32
    b_in = b_in.astype(jnp.float32)[None, :]            # (1, Fk)
    b_out = b_out.astype(jnp.float32)                   # (1, outw_k)

    # --- batch tiling (each kernel row covers P original batch rows) ---
    rows = -(-B // P)                                   # kernel rows needed
    r8 = _round_up(max(rows, 1), 8)
    # Big tiles amortize the ~0.35us/step pipeline overhead, but keep >=4 grid
    # steps (>=2 per megacore TensorCore) once the batch allows it.
    cap = max(128, _round_up(-(-r8 // 4), 8))
    tb = max(8, (min(int(tile_b), cap, r8) // 8) * 8)
    rows_pad = _round_up(rows, tb)
    num_tiles = rows_pad // tb
    B_pad = rows_pad * P

    x_p = jnp.pad(x.astype(jnp.float32), ((0, B_pad - B), (0, 0)))
    x_p = x_p.reshape(rows_pad, n_in_k)                 # pair rows when packed

    itemsize = jnp.dtype(compute_dtype).itemsize
    weight_bytes = ((N_HIDDEN * Fk * Fk + Fk * outw_k) * itemsize
                    + (N_HIDDEN * Fk + 2 * Fk + outw_k + n_in_k * Fk) * 4)
    cost = pl.CostEstimate(
        flops=2 * rows_pad * (N_HIDDEN * Fk * Fk + Fk * outw_k),
        transcendentals=0,
        bytes_accessed=rows_pad * (n_in_k + outw_k) * 4 + weight_bytes,
    )

    kernel = functools.partial(mlp_skip_kernel, compute_dtype=compute_dtype)

    out_pad = pl.pallas_call(
        kernel,
        out_shape=jax.ShapeDtypeStruct((rows_pad, outw_k), jnp.float32),
        grid=(num_tiles,),
        in_specs=[
            pl.BlockSpec((tb, n_in_k), lambda i: (i, 0)),            # x tile
            pl.BlockSpec((n_in_k, Fk), lambda i: (0, 0)),            # w_in (resident)
            pl.BlockSpec((1, Fk), lambda i: (0, 0)),                 # b_in
            pl.BlockSpec((N_HIDDEN, Fk, Fk), lambda i: (0, 0, 0)),   # w_hid
            pl.BlockSpec((N_HIDDEN, 1, Fk), lambda i: (0, 0, 0)),    # b_hid
            pl.BlockSpec((Fk, outw_k), lambda i: (0, 0)),            # w_out
            pl.BlockSpec((1, outw_k), lambda i: (0, 0)),             # b_out
        ],
        out_specs=pl.BlockSpec((tb, outw_k), lambda i: (i, 0)),
        compiler_params=pltpu.CompilerParams(
            dimension_semantics=("parallel",)),
        cost_estimate=cost,
    )(x_p, w_in, b_in, w_hid, b_hid, w_out, b_out)

    # Un-pair packed rows (cheap: slab is only 16*P f32 lanes wide) and strip
    # the batch/output padding.
    out = out_pad.reshape(rows_pad * P, OUT_W)
    return out[:B, :N_OUT]


# ---------------------------------------------------------------------------
# Deterministic parameter construction (mimics nn.Linear / BatchNorm1d shapes).
# ---------------------------------------------------------------------------
def init_params(key):
    ks = jax.random.split(key, 6 + 2 * N_HIDDEN)
    F = N_HIDDEN_SIZE

    def lin(k, fan_in, fan_out):
        kw, kb = jax.random.split(k)
        bound = 1.0 / jnp.sqrt(fan_in)
        w = jax.random.uniform(kw, (fan_in, fan_out), jnp.float32, -bound, bound)
        b = jax.random.uniform(kb, (fan_out,), jnp.float32, -bound, bound)
        return w, b

    def bn(k):
        k1, k2, k3, k4 = jax.random.split(k, 4)
        gamma = 1.0 + 0.1 * jax.random.normal(k1, (F,), jnp.float32)
        beta = 0.1 * jax.random.normal(k2, (F,), jnp.float32)
        mean = 0.05 * jax.random.normal(k3, (F,), jnp.float32)
        var = 1.0 + 0.1 * jax.random.uniform(k4, (F,), jnp.float32)
        return gamma, beta, mean, var

    p = {}
    p["w_in"], p["b_in"] = lin(ks[0], N_IN, F)
    p["g_in"], p["be_in"], p["m_in"], p["v_in"] = bn(ks[1])

    w_hid, b_hid, g_hid, be_hid, m_hid, v_hid = [], [], [], [], [], []
    for l in range(N_HIDDEN):
        w, b = lin(ks[2 + 2 * l], F, F)
        g, be, m, v = bn(ks[3 + 2 * l])
        w_hid.append(w); b_hid.append(b)
        g_hid.append(g); be_hid.append(be); m_hid.append(m); v_hid.append(v)
    p["w_hid"] = jnp.stack(w_hid)
    p["b_hid"] = jnp.stack(b_hid)
    p["g_hid"] = jnp.stack(g_hid)
    p["be_hid"] = jnp.stack(be_hid)
    p["m_hid"] = jnp.stack(m_hid)
    p["v_hid"] = jnp.stack(v_hid)

    p["w_out"], p["b_out"] = lin(ks[2 + 2 * N_HIDDEN], F, N_OUT)
    return p


# ---------------------------------------------------------------------------
# Pure-JAX f32 reference (same folded-BN eval semantics).
# ---------------------------------------------------------------------------
def ref_forward(x, params):
    w_in, b_in = fold_bn(params["w_in"], params["b_in"], params["g_in"],
                         params["be_in"], params["m_in"], params["v_in"])
    h = jnp.maximum(x @ w_in + b_in, 0.0)

    def block(h, lo, hi):
        skip = h
        for l in range(lo, hi):
            w, b = fold_bn(params["w_hid"][l], params["b_hid"][l],
                           params["g_hid"][l], params["be_hid"][l],
                           params["m_hid"][l], params["v_hid"][l])
            z = h @ w + b
            h = jnp.maximum(z, 0.0) if l < hi - 1 else z
        return jnp.maximum(h + skip, 0.0)

    h = block(h, 0, NSKIP)
    h = block(h, NSKIP, N_HIDDEN)
    return h @ params["w_out"] + params["b_out"]


if __name__ == "__main__":
    key = jax.random.PRNGKey(0)
    kp, kx = jax.random.split(key)
    params = init_params(kp)

    # 1) Small batch, pure-f32 compute, unpacked (128-wide) path: exact check.
    x_a = jax.random.normal(kx, (8, N_IN), jnp.float32)
    out_a = jax.block_until_ready(
        three_body_mlp_skip(x_a, params, compute_dtype=jnp.float32, pack=False))
    ref_a = ref_forward(x_a, params)
    assert out_a.shape == (8, N_OUT), out_a.shape
    assert jnp.allclose(out_a, ref_a, atol=1e-4, rtol=1e-4), \
        f"f32 unpacked max abs diff {jnp.max(jnp.abs(out_a - ref_a))}"

    # 2) Odd batch, pure-f32 compute, lane-packed (256-wide block-diagonal)
    #    path: exact check of the packing / un-pairing math + tail padding.
    x_b = jax.random.normal(jax.random.fold_in(kx, 1), (9, N_IN), jnp.float32)
    out_b = jax.block_until_ready(
        three_body_mlp_skip(x_b, params, compute_dtype=jnp.float32, pack=True))
    ref_b = ref_forward(x_b, params)
    assert out_b.shape == (9, N_OUT), out_b.shape
    assert jnp.allclose(out_b, ref_b, atol=1e-4, rtol=1e-4), \
        f"f32 packed max abs diff {jnp.max(jnp.abs(out_b - ref_b))}"

    # 3) Larger non-multiple-of-tile batch, default bf16 matmuls, auto packing:
    #    exercises the batch grid, adaptive tile, narrow output writeback.
    x_c = jax.random.normal(jax.random.fold_in(kx, 2), (1000, N_IN), jnp.float32)
    out_c = jax.block_until_ready(three_body_mlp_skip(x_c, params))
    ref_c = ref_forward(x_c, params)
    assert out_c.shape == (1000, N_OUT), out_c.shape
    max_err = jnp.max(jnp.abs(out_c - ref_c))
    assert max_err < 1e-1, f"bf16 max abs diff {max_err}"

    print("KERNEL_OK")
</pallas_src>

<mosaic_0001>
module attributes {stable_mosaic.version = 11 : i64} {
  func.func @mlp_skip_kernel(%arg0: i32, %arg1: memref<8x3xf32, #tpu.memory_space<vmem>>, %arg2: memref<3x128xf32, #tpu.memory_space<vmem>>, %arg3: memref<1x128xf32, #tpu.memory_space<vmem>>, %arg4: memref<10x128x128xf32, #tpu.memory_space<vmem>>, %arg5: memref<10x1x128xf32, #tpu.memory_space<vmem>>, %arg6: memref<128x16xf32, #tpu.memory_space<vmem>>, %arg7: memref<1x16xf32, #tpu.memory_space<vmem>>, %arg8: memref<8x16xf32, #tpu.memory_space<vmem>>) attributes {dimension_semantics = [#tpu.dimension_semantics<parallel>], iteration_bounds = array<i64: 1>, scalar_prefetch = 0 : i64, scratch_operands = 0 : i64, tpu.core_type = #tpu.core_type<tc>, window_params = [{transform_indices = @transform_0, window_bounds = array<i64: 8, 3>}, {pipeline_mode = #tpu.pipeline_mode<synchronous>, transform_indices = @transform_1, window_bounds = array<i64: 3, 128>}, {pipeline_mode = #tpu.pipeline_mode<synchronous>, transform_indices = @transform_2, window_bounds = array<i64: 1, 128>}, {pipeline_mode = #tpu.pipeline_mode<synchronous>, transform_indices = @transform_3, window_bounds = array<i64: 10, 128, 128>}, {pipeline_mode = #tpu.pipeline_mode<synchronous>, transform_indices = @transform_4, window_bounds = array<i64: 10, 1, 128>}, {pipeline_mode = #tpu.pipeline_mode<synchronous>, transform_indices = @transform_5, window_bounds = array<i64: 128, 16>}, {pipeline_mode = #tpu.pipeline_mode<synchronous>, transform_indices = @transform_6, window_bounds = array<i64: 1, 16>}, {transform_indices = @transform_7, window_bounds = array<i64: 8, 16>}]} {
    %c0 = arith.constant 0 : index
    %c0_0 = arith.constant 0 : index
    %0 = vector.load %arg1[%c0, %c0_0] : memref<8x3xf32, #tpu.memory_space<vmem>>, vector<8x3xf32>
    %c0_1 = arith.constant 0 : index
    %c0_2 = arith.constant 0 : index
    %1 = vector.load %arg2[%c0_1, %c0_2] : memref<3x128xf32, #tpu.memory_space<vmem>>, vector<3x128xf32>
    %c0_3 = arith.constant 0 : index
    %c0_4 = arith.constant 0 : index
    %2 = vector.load %arg3[%c0_3, %c0_4] : memref<1x128xf32, #tpu.memory_space<vmem>>, vector<1x128xf32>
    %3 = vector.extract_strided_slice %0 {offsets = [0, 0], sizes = [8, 1], strides = [1, 1]} : vector<8x3xf32> to vector<8x1xf32>
    %4 = vector.extract_strided_slice %1 {offsets = [0, 0], sizes = [1, 128], strides = [1, 1]} : vector<3x128xf32> to vector<1x128xf32>
    %5 = vector.broadcast %3 : vector<8x1xf32> to vector<8x128xf32>
    %6 = vector.broadcast %4 : vector<1x128xf32> to vector<8x128xf32>
    %7 = arith.mulf %5, %6 : vector<8x128xf32>
    %8 = vector.broadcast %2 : vector<1x128xf32> to vector<8x128xf32>
    %9 = arith.addf %8, %7 : vector<8x128xf32>
    %10 = vector.extract_strided_slice %0 {offsets = [0, 1], sizes = [8, 1], strides = [1, 1]} : vector<8x3xf32> to vector<8x1xf32>
    %11 = vector.extract_strided_slice %1 {offsets = [1, 0], sizes = [1, 128], strides = [1, 1]} : vector<3x128xf32> to vector<1x128xf32>
    %12 = vector.broadcast %10 : vector<8x1xf32> to vector<8x128xf32>
    %13 = vector.broadcast %11 : vector<1x128xf32> to vector<8x128xf32>
    %14 = arith.mulf %12, %13 : vector<8x128xf32>
    %15 = arith.addf %9, %14 : vector<8x128xf32>
    %16 = vector.extract_strided_slice %0 {offsets = [0, 2], sizes = [8, 1], strides = [1, 1]} : vector<8x3xf32> to vector<8x1xf32>
    %17 = vector.extract_strided_slice %1 {offsets = [2, 0], sizes = [1, 128], strides = [1, 1]} : vector<3x128xf32> to vector<1x128xf32>
    %18 = vector.broadcast %16 : vector<8x1xf32> to vector<8x128xf32>
    %19 = vector.broadcast %17 : vector<1x128xf32> to vector<8x128xf32>
    %20 = arith.mulf %18, %19 : vector<8x128xf32>
    %21 = arith.addf %15, %20 : vector<8x128xf32>
    %cst = arith.constant 0.000000e+00 : f32
    %22 = vector.broadcast %cst : f32 to vector<8x128xf32>
    %23 = arith.maximumf %21, %22 : vector<8x128xf32>
    %c0_5 = arith.constant 0 : index
    %c0_6 = arith.constant 0 : index
    %c0_7 = arith.constant 0 : index
    %24 = vector.load %arg4[%c0_5, %c0_6, %c0_7] : memref<10x128x128xf32, #tpu.memory_space<vmem>>, vector<1x128x128xf32>
    %25 = vector.shape_cast %24 : vector<1x128x128xf32> to vector<128x128xf32>
    %cst_8 = arith.constant dense<0.000000e+00> : vector<8x128xf32>
    %26 = tpu.matmul %23, %25, %cst_8 {dimension_numbers = #tpu.dot_dimension_numbers<[1], [0], [0], [1], [0, 0, 1, 1], [], []>} : vector<8x128xf32>, vector<128x128xf32>, vector<8x128xf32> -> vector<8x128xf32>
    %c0_9 = arith.constant 0 : index
    %c0_10 = arith.constant 0 : index
    %c0_11 = arith.constant 0 : index
    %27 = vector.load %arg5[%c0_9, %c0_10, %c0_11] : memref<10x1x128xf32, #tpu.memory_space<vmem>>, vector<1x1x128xf32>
    %28 = vector.shape_cast %27 : vector<1x1x128xf32> to vector<1x128xf32>
    %29 = vector.broadcast %28 : vector<1x128xf32> to vector<8x128xf32>
    %30 = arith.addf %26, %29 : vector<8x128xf32>
    %cst_12 = arith.constant 0.000000e+00 : f32
    %31 = vector.broadcast %cst_12 : f32 to vector<8x128xf32>
    %32 = arith.maximumf %30, %31 : vector<8x128xf32>
    %c1 = arith.constant 1 : index
    %c0_13 = arith.constant 0 : index
    %c0_14 = arith.constant 0 : index
    %33 = vector.load %arg4[%c1, %c0_13, %c0_14] : memref<10x128x128xf32, #tpu.memory_space<vmem>>, vector<1x128x128xf32>
    %34 = vector.shape_cast %33 : vector<1x128x128xf32> to vector<128x128xf32>
    %cst_15 = arith.constant dense<0.000000e+00> : vector<8x128xf32>
    %35 = tpu.matmul %32, %34, %cst_15 {dimension_numbers = #tpu.dot_dimension_numbers<[1], [0], [0], [1], [0, 0, 1, 1], [], []>} : vector<8x128xf32>, vector<128x128xf32>, vector<8x128xf32> -> vector<8x128xf32>
    %c1_16 = arith.constant 1 : index
    %c0_17 = arith.constant 0 : index
    %c0_18 = arith.constant 0 : index
    %36 = vector.load %arg5[%c1_16, %c0_17, %c0_18] : memref<10x1x128xf32, #tpu.memory_space<vmem>>, vector<1x1x128xf32>
    %37 = vector.shape_cast %36 : vector<1x1x128xf32> to vector<1x128xf32>
    %38 = vector.broadcast %37 : vector<1x128xf32> to vector<8x128xf32>
    %39 = arith.addf %35, %38 : vector<8x128xf32>
    %cst_19 = arith.constant 0.000000e+00 : f32
    %40 = vector.broadcast %cst_19 : f32 to vector<8x128xf32>
    %41 = arith.maximumf %39, %40 : vector<8x128xf32>
    %c2 = arith.constant 2 : index
    %c0_20 = arith.constant 0 : index
    %c0_21 = arith.constant 0 : index
    %42 = vector.load %arg4[%c2, %c0_20, %c0_21] : memref<10x128x128xf32, #tpu.memory_space<vmem>>, vector<1x128x128xf32>
    %43 = vector.shape_cast %42 : vector<1x128x128xf32> to vector<128x128xf32>
    %cst_22 = arith.constant dense<0.000000e+00> : vector<8x128xf32>
    %44 = tpu.matmul %41, %43, %cst_22 {dimension_numbers = #tpu.dot_dimension_numbers<[1], [0], [0], [1], [0, 0, 1, 1], [], []>} : vector<8x128xf32>, vector<128x128xf32>, vector<8x128xf32> -> vector<8x128xf32>
    %c2_23 = arith.constant 2 : index
    %c0_24 = arith.constant 0 : index
    %c0_25 = arith.constant 0 : index
    %45 = vector.load %arg5[%c2_23, %c0_24, %c0_25] : memref<10x1x128xf32, #tpu.memory_space<vmem>>, vector<1x1x128xf32>
    %46 = vector.shape_cast %45 : vector<1x1x128xf32> to vector<1x128xf32>
    %47 = vector.broadcast %46 : vector<1x128xf32> to vector<8x128xf32>
    %48 = arith.addf %44, %47 : vector<8x128xf32>
    %cst_26 = arith.constant 0.000000e+00 : f32
    %49 = vector.broadcast %cst_26 : f32 to vector<8x128xf32>
    %50 = arith.maximumf %48, %49 : vector<8x128xf32>
    %c3 = arith.constant 3 : index
    %c0_27 = arith.constant 0 : index
    %c0_28 = arith.constant 0 : index
    %51 = vector.load %arg4[%c3, %c0_27, %c0_28] : memref<10x128x128xf32, #tpu.memory_space<vmem>>, vector<1x128x128xf32>
    %52 = vector.shape_cast %51 : vector<1x128x128xf32> to vector<128x128xf32>
    %cst_29 = arith.constant dense<0.000000e+00> : vector<8x128xf32>
    %53 = tpu.matmul %50, %52, %cst_29 {dimension_numbers = #tpu.dot_dimension_numbers<[1], [0], [0], [1], [0, 0, 1, 1], [], []>} : vector<8x128xf32>, vector<128x128xf32>, vector<8x128xf32> -> vector<8x128xf32>
    %c3_30 = arith.constant 3 : index
    %c0_31 = arith.constant 0 : index
    %c0_32 = arith.constant 0 : index
    %54 = vector.load %arg5[%c3_30, %c0_31, %c0_32] : memref<10x1x128xf32, #tpu.memory_space<vmem>>, vector<1x1x128xf32>
    %55 = vector.shape_cast %54 : vector<1x1x128xf32> to vector<1x128xf32>
    %56 = vector.broadcast %55 : vector<1x128xf32> to vector<8x128xf32>
    %57 = arith.addf %53, %56 : vector<8x128xf32>
    %cst_33 = arith.constant 0.000000e+00 : f32
    %58 = vector.broadcast %cst_33 : f32 to vector<8x128xf32>
    %59 = arith.maximumf %57, %58 : vector<8x128xf32>
    %c4 = arith.constant 4 : index
    %c0_34 = arith.constant 0 : index
    %c0_35 = arith.constant 0 : index
    %60 = vector.load %arg4[%c4, %c0_34, %c0_35] : memref<10x128x128xf32, #tpu.memory_space<vmem>>, vector<1x128x128xf32>
    %61 = vector.shape_cast %60 : vector<1x128x128xf32> to vector<128x128xf32>
    %cst_36 = arith.constant dense<0.000000e+00> : vector<8x128xf32>
    %62 = tpu.matmul %59, %61, %cst_36 {dimension_numbers = #tpu.dot_dimension_numbers<[1], [0], [0], [1], [0, 0, 1, 1], [], []>} : vector<8x128xf32>, vector<128x128xf32>, vector<8x128xf32> -> vector<8x128xf32>
    %c4_37 = arith.constant 4 : index
    %c0_38 = arith.constant 0 : index
    %c0_39 = arith.constant 0 : index
    %63 = vector.load %arg5[%c4_37, %c0_38, %c0_39] : memref<10x1x128xf32, #tpu.memory_space<vmem>>, vector<1x1x128xf32>
    %64 = vector.shape_cast %63 : vector<1x1x128xf32> to vector<1x128xf32>
    %65 = vector.broadcast %64 : vector<1x128xf32> to vector<8x128xf32>
    %66 = arith.addf %62, %65 : vector<8x128xf32>
    %67 = arith.addf %66, %23 : vector<8x128xf32>
    %cst_40 = arith.constant 0.000000e+00 : f32
    %68 = vector.broadcast %cst_40 : f32 to vector<8x128xf32>
    %69 = arith.maximumf %67, %68 : vector<8x128xf32>
    %c5 = arith.constant 5 : index
    %c0_41 = arith.constant 0 : index
    %c0_42 = arith.constant 0 : index
    %70 = vector.load %arg4[%c5, %c0_41, %c0_42] : memref<10x128x128xf32, #tpu.memory_space<vmem>>, vector<1x128x128xf32>
    %71 = vector.shape_cast %70 : vector<1x128x128xf32> to vector<128x128xf32>
    %cst_43 = arith.constant dense<0.000000e+00> : vector<8x128xf32>
    %72 = tpu.matmul %69, %71, %cst_43 {dimension_numbers = #tpu.dot_dimension_numbers<[1], [0], [0], [1], [0, 0, 1, 1], [], []>} : vector<8x128xf32>, vector<128x128xf32>, vector<8x128xf32> -> vector<8x128xf32>
    %c5_44 = arith.constant 5 : index
    %c0_45 = arith.constant 0 : index
    %c0_46 = arith.constant 0 : index
    %73 = vector.load %arg5[%c5_44, %c0_45, %c0_46] : memref<10x1x128xf32, #tpu.memory_space<vmem>>, vector<1x1x128xf32>
    %74 = vector.shape_cast %73 : vector<1x1x128xf32> to vector<1x128xf32>
    %75 = vector.broadcast %74 : vector<1x128xf32> to vector<8x128xf32>
    %76 = arith.addf %72, %75 : vector<8x128xf32>
    %cst_47 = arith.constant 0.000000e+00 : f32
    %77 = vector.broadcast %cst_47 : f32 to vector<8x128xf32>
    %78 = arith.maximumf %76, %77 : vector<8x128xf32>
    %c6 = arith.constant 6 : index
    %c0_48 = arith.constant 0 : index
    %c0_49 = arith.constant 0 : index
    %79 = vector.load %arg4[%c6, %c0_48, %c0_49] : memref<10x128x128xf32, #tpu.memory_space<vmem>>, vector<1x128x128xf32>
    %80 = vector.shape_cast %79 : vector<1x128x128xf32> to vector<128x128xf32>
    %cst_50 = arith.constant dense<0.000000e+00> : vector<8x128xf32>
    %81 = tpu.matmul %78, %80, %cst_50 {dimension_numbers = #tpu.dot_dimension_numbers<[1], [0], [0], [1], [0, 0, 1, 1], [], []>} : vector<8x128xf32>, vector<128x128xf32>, vector<8x128xf32> -> vector<8x128xf32>
    %c6_51 = arith.constant 6 : index
    %c0_52 = arith.constant 0 : index
    %c0_53 = arith.constant 0 : index
    %82 = vector.load %arg5[%c6_51, %c0_52, %c0_53] : memref<10x1x128xf32, #tpu.memory_space<vmem>>, vector<1x1x128xf32>
    %83 = vector.shape_cast %82 : vector<1x1x128xf32> to vector<1x128xf32>
    %84 = vector.broadcast %83 : vector<1x128xf32> to vector<8x128xf32>
    %85 = arith.addf %81, %84 : vector<8x128xf32>
    %cst_54 = arith.constant 0.000000e+00 : f32
    %86 = vector.broadcast %cst_54 : f32 to vector<8x128xf32>
    %87 = arith.maximumf %85, %86 : vector<8x128xf32>
    %c7 = arith.constant 7 : index
    %c0_55 = arith.constant 0 : index
    %c0_56 = arith.constant 0 : index
    %88 = vector.load %arg4[%c7, %c0_55, %c0_56] : memref<10x128x128xf32, #tpu.memory_space<vmem>>, vector<1x128x128xf32>
    %89 = vector.shape_cast %88 : vector<1x128x128xf32> to vector<128x128xf32>
    %cst_57 = arith.constant dense<0.000000e+00> : vector<8x128xf32>
    %90 = tpu.matmul %87, %89, %cst_57 {dimension_numbers = #tpu.dot_dimension_numbers<[1], [0], [0], [1], [0, 0, 1, 1], [], []>} : vector<8x128xf32>, vector<128x128xf32>, vector<8x128xf32> -> vector<8x128xf32>
    %c7_58 = arith.constant 7 : index
    %c0_59 = arith.constant 0 : index
    %c0_60 = arith.constant 0 : index
    %91 = vector.load %arg5[%c7_58, %c0_59, %c0_60] : memref<10x1x128xf32, #tpu.memory_space<vmem>>, vector<1x1x128xf32>
    %92 = vector.shape_cast %91 : vector<1x1x128xf32> to vector<1x128xf32>
    %93 = vector.broadcast %92 : vector<1x128xf32> to vector<8x128xf32>
    %94 = arith.addf %90, %93 : vector<8x128xf32>
    %cst_61 = arith.constant 0.000000e+00 : f32
    %95 = vector.broadcast %cst_61 : f32 to vector<8x128xf32>
    %96 = arith.maximumf %94, %95 : vector<8x128xf32>
    %c8 = arith.constant 8 : index
    %c0_62 = arith.constant 0 : index
    %c0_63 = arith.constant 0 : index
    %97 = vector.load %arg4[%c8, %c0_62, %c0_63] : memref<10x128x128xf32, #tpu.memory_space<vmem>>, vector<1x128x128xf32>
    %98 = vector.shape_cast %97 : vector<1x128x128xf32> to vector<128x128xf32>
    %cst_64 = arith.constant dense<0.000000e+00> : vector<8x128xf32>
    %99 = tpu.matmul %96, %98, %cst_64 {dimension_numbers = #tpu.dot_dimension_numbers<[1], [0], [0], [1], [0, 0, 1, 1], [], []>} : vector<8x128xf32>, vector<128x128xf32>, vector<8x128xf32> -> vector<8x128xf32>
    %c8_65 = arith.constant 8 : index
    %c0_66 = arith.constant 0 : index
    %c0_67 = arith.constant 0 : index
    %100 = vector.load %arg5[%c8_65, %c0_66, %c0_67] : memref<10x1x128xf32, #tpu.memory_space<vmem>>, vector<1x1x128xf32>
    %101 = vector.shape_cast %100 : vector<1x1x128xf32> to vector<1x128xf32>
    %102 = vector.broadcast %101 : vector<1x128xf32> to vector<8x128xf32>
    %103 = arith.addf %99, %102 : vector<8x128xf32>
    %cst_68 = arith.constant 0.000000e+00 : f32
    %104 = vector.broadcast %cst_68 : f32 to vector<8x128xf32>
    %105 = arith.maximumf %103, %104 : vector<8x128xf32>
    %c9 = arith.constant 9 : index
    %c0_69 = arith.constant 0 : index
    %c0_70 = arith.constant 0 : index
    %106 = vector.load %arg4[%c9, %c0_69, %c0_70] : memref<10x128x128xf32, #tpu.memory_space<vmem>>, vector<1x128x128xf32>
    %107 = vector.shape_cast %106 : vector<1x128x128xf32> to vector<128x128xf32>
    %cst_71 = arith.constant dense<0.000000e+00> : vector<8x128xf32>
    %108 = tpu.matmul %105, %107, %cst_71 {dimension_numbers = #tpu.dot_dimension_numbers<[1], [0], [0], [1], [0, 0, 1, 1], [], []>} : vector<8x128xf32>, vector<128x128xf32>, vector<8x128xf32> -> vector<8x128xf32>
    %c9_72 = arith.constant 9 : index
    %c0_73 = arith.constant 0 : index
    %c0_74 = arith.constant 0 : index
    %109 = vector.load %arg5[%c9_72, %c0_73, %c0_74] : memref<10x1x128xf32, #tpu.memory_space<vmem>>, vector<1x1x128xf32>
    %110 = vector.shape_cast %109 : vector<1x1x128xf32> to vector<1x128xf32>
    %111 = vector.broadcast %110 : vector<1x128xf32> to vector<8x128xf32>
    %112 = arith.addf %108, %111 : vector<8x128xf32>
    %113 = arith.addf %112, %69 : vector<8x128xf32>
    %cst_75 = arith.constant 0.000000e+00 : f32
    %114 = vector.broadcast %cst_75 : f32 to vector<8x128xf32>
    %115 = arith.maximumf %113, %114 : vector<8x128xf32>
    %c0_76 = arith.constant 0 : index
    %c0_77 = arith.constant 0 : index
    %116 = vector.load %arg6[%c0_76, %c0_77] : memref<128x16xf32, #tpu.memory_space<vmem>>, vector<128x16xf32>
    %cst_78 = arith.constant dense<0.000000e+00> : vector<8x16xf32>
    %117 = tpu.matmul %115, %116, %cst_78 {dimension_numbers = #tpu.dot_dimension_numbers<[1], [0], [0], [1], [0, 0, 1, 1], [], []>} : vector<8x128xf32>, vector<128x16xf32>, vector<8x16xf32> -> vector<8x16xf32>
    %c0_79 = arith.constant 0 : index
    %c0_80 = arith.constant 0 : index
    %118 = vector.load %arg7[%c0_79, %c0_80] : memref<1x16xf32, #tpu.memory_space<vmem>>, vector<1x16xf32>
    %119 = vector.broadcast %118 : vector<1x16xf32> to vector<8x16xf32>
    %120 = arith.addf %117, %119 : vector<8x16xf32>
    %c0_81 = arith.constant 0 : index
    %c0_82 = arith.constant 0 : index
    %121 = vector.load %arg8[%c0_81, %c0_82] : memref<8x16xf32, #tpu.memory_space<vmem>>, vector<8x16xf32>
    tpu.vector_store %arg8[%c0_81, %c0_82], %120 {strides = array<i32>} : memref<8x16xf32, #tpu.memory_space<vmem>>, vector<8x16xf32>,
    return
  }
  func.func @transform_0(%arg0: i32) -> (i32, i32) {
    %c0_i32 = arith.constant 0 : i32
    %c0_i32_0 = arith.constant 0 : i32
    return %arg0, %c0_i32 : i32, i32
  }
  func.func @transform_1(%arg0: i32) -> (i32, i32) {
    %c0_i32 = arith.constant 0 : i32
    %c0_i32_0 = arith.constant 0 : i32
    %c0_i32_1 = arith.constant 0 : i32
    return %c0_i32, %c0_i32_0 : i32, i32
  }
  func.func @transform_2(%arg0: i32) -> (i32, i32) {
    %c0_i32 = arith.constant 0 : i32
    %c0_i32_0 = arith.constant 0 : i32
    %c0_i32_1 = arith.constant 0 : i32
    return %c0_i32, %c0_i32_0 : i32, i32
  }
  func.func @transform_3(%arg0: i32) -> (i32, i32, i32) {
    %c0_i32 = arith.constant 0 : i32
    %c0_i32_0 = arith.constant 0 : i32
    %c0_i32_1 = arith.constant 0 : i32
    %c0_i32_2 = arith.constant 0 : i32
    return %c0_i32, %c0_i32_0, %c0_i32_1 : i32, i32, i32
  }
  func.func @transform_4(%arg0: i32) -> (i32, i32, i32) {
    %c0_i32 = arith.constant 0 : i32
    %c0_i32_0 = arith.constant 0 : i32
    %c0_i32_1 = arith.constant 0 : i32
    %c0_i32_2 = arith.constant 0 : i32
    return %c0_i32, %c0_i32_0, %c0_i32_1 : i32, i32, i32
  }
  func.func @transform_5(%arg0: i32) -> (i32, i32) {
    %c0_i32 = arith.constant 0 : i32
    %c0_i32_0 = arith.constant 0 : i32
    %c0_i32_1 = arith.constant 0 : i32
    return %c0_i32, %c0_i32_0 : i32, i32
  }
  func.func @transform_6(%arg0: i32) -> (i32, i32) {
    %c0_i32 = arith.constant 0 : i32
    %c0_i32_0 = arith.constant 0 : i32
    %c0_i32_1 = arith.constant 0 : i32
    return %c0_i32, %c0_i32_0 : i32, i32
  }
  func.func @transform_7(%arg0: i32) -> (i32, i32) {
    %c0_i32 = arith.constant 0 : i32
    %c0_i32_0 = arith.constant 0 : i32
    return %arg0, %c0_i32 : i32, i32
  }
}

</mosaic_0001>

<bundles_post_ra>
// kernel: three_body_mlp_skip.1
= control target key start
LH: loop header
LB: loop body
LE: loop exit
PB: predicated region body
PF: predicated region fallthrough
CT: control target
= control target key end

     0   :  { %v2173_v2 = vmov 0   ;;  %v2174_v3 = vmov 2   ;;  %v2175_v8 = vmov 0.0|0.0   ;;  %v2176_v12 = vmov 1   ;;  %s2926_s0 = inlined_call_operand.vmem [shape: f32[8,3], index: 0, kind: input, shape index: {}]   ;;  %s2927_s1 = inlined_call_operand.vmem [shape: f32[3,128], index: 1, kind: input, shape index: {}]   ;;  %s2928_s2 = inlined_call_operand.vmem [shape: f32[1,128], index: 2, kind: input, shape index: {}]   ;;  %s2929_s3 = inlined_call_operand.vmem [shape: f32[10,128,128], index: 3, kind: input, shape index: {}]   ;;  %s2930_s4 = inlined_call_operand.vmem [shape: f32[10,1,128], index: 4, kind: input, shape index: {}]   ;;  %s2931_s5 = inlined_call_operand.vmem [shape: f32[128,16], index: 5, kind: input, shape index: {}]   ;;  %s2932_s6 = inlined_call_operand.vmem [shape: f32[1,16], index: 6, kind: input, shape index: {}]   ;;  %s2933_s7 = inlined_call_operand.hbm [shape: f32[8,16], index: 7, kind: output, shape index: {}]  }
   0x1   :  { %v27_v0 = vld [vmem:[%s2926_s0] sm:$0xff]  ;;  %2145 = vset.pattern.permute.xlu0 %v2173_v2  ;;  %2147 = vset.pattern.permute.xlu1 %v2174_v3  ;;  %v69_v4 = vld [vmem:[%s2929_s3 + $0x8] sm:$0xff]  ;;  %v70_v5 = vld [vmem:[%s2929_s3 + $0x10] sm:$0xff] }
   0x2   :  { %v68_v1 = vld [vmem:[%s2929_s3] sm:$0xff]  ;;  %v71_v6 = vld [vmem:[%s2929_s3 + $0x18] sm:$0xff]  ;;  %32 = vperm.xlu0 %2145, %v27_v0   ;;  %58 = vperm.xlu1 %2147, %v27_v0   ;;  %v73_v11 = vld [vmem:[%s2929_s3 + $0x28] sm:$0xff] }
   0x3   :  { %v1875_v7 = vpack.c.bf16 %v69_v4, %v68_v1  ;;  %1874 = vmatprep.subr.bf16.mxu0 %v2175_v8  ;;  %1898 = vmatprep.subr.bf16.mxu1 %v2175_v8  ;;  %v1878_v9 = vpack.c.bf16 %v71_v6, %v70_v5  ;;  %v72_v10 = vld [vmem:[%s2929_s3 + $0x20] sm:$0xff] }
   0x5   :  { %1876 = vmatpush3.bf16.msra.mxu0 %v1875_v7 }
   0x6   :  { %1877 = vmatprep.subr.bf16.mxu0 %v2175_v8  ;;  %2146 = vset.pattern.permute.xlu0 %v2176_v12 }
   0x7   :  { %12 = vsyncpa [#allocation3], 0  ;;  %48 = vperm.xlu0 %2146, %v27_v0   ;;  %v1881_v13 = vpack.c.bf16 %v73_v11, %v72_v10  ;;  %v74_v14 = vld [vmem:[%s2929_s3 + $0x30] sm:$0xff]  ;;  %v75_v15 = vld [vmem:[%s2929_s3 + $0x38] sm:$0xff]  ;;  %vm2177_vm0 = vmmov 0   ;;  %v2178_v19 = vmov 0.0   ;;  %v35_v51 = vlaneseq }
   0x8   :  { %v1884_v16 = vpack.c.bf16 %v75_v15, %v74_v14  ;;  %v76_v17 = vld [vmem:[%s2929_s3 + $0x40] sm:$0xff]  ;;  %v77_v18 = vld [vmem:[%s2929_s3 + $0x48] sm:$0xff]  ;;  %1521 = vmatprep.mubr.msk.f32.mxu0 %vm2177_vm0, %v2178_v19  ;;  %1556 = vmatprep.mubr.msk.f32.mxu1 %vm2177_vm0, %v2178_v19  ;;  %v1141_v22 = vld [vmem:[%s2929_s3 + $0x90] sm:$0xff]  ;;  %vm1121_vm1 = vcmask 130048  }
   0x9   :  { %1879 = vmatpush3.bf16.msra.mxu0 %v1878_v9  ;;  %v1139_v20 = vld [vmem:[%s2929_s3 + $0x80] sm:$0xff]  ;;  %v1140_v21 = vld [vmem:[%s2929_s3 + $0x88] sm:$0xff]  ;;  %v1887_v23 = vpack.c.bf16 %v77_v18, %v76_v17  ;;  %v1142_v25 = vld [vmem:[%s2929_s3 + $0x98] sm:$0xff]  ;;  %v36_v52 = vshrl.u32 %v35_v51, 7 }
   0xa   :  { %1880 = vmatprep.subr.bf16.mxu0 %v2175_v8  ;;  %v1899_v24 = vpack.c.bf16 %v1140_v21, %v1139_v20  ;;  %v78_v26 = vld [vmem:[%s2929_s3 + $0x50] sm:$0xff]  ;;  %v79_v27 = vld [vmem:[%s2929_s3 + $0x58] sm:$0xff]  ;;  %v1902_v28 = vpack.c.bf16 %v1142_v25, %v1141_v22  ;;  %v1143_v29 = vld [vmem:[%s2929_s3 + $0xa0] sm:$0xff] }
   0xb   :  { %2148 = vset.pattern.permute.xlu0 %v2174_v3  ;;  %v1144_v30 = vld [vmem:[%s2929_s3 + $0xa8] sm:$0xff]  ;;  %v1890_v31 = vpack.c.bf16 %v79_v27, %v78_v26  ;;  %v80_v32 = vld [vmem:[%s2929_s3 + $0x60] sm:$0xff]  ;;  %v1145_v35 = vld [vmem:[%s2929_s3 + $0xb0] sm:$0xff]  ;;  %v37_v53 = vsub.s32 0, %v36_v52  ;;  %v53_v56 = vsub.s32 1, %v36_v52  ;;  %v63_v57 = vsub.s32 2, %v36_v52 }
   0xc   :  { %1900 = vmatpush3.bf16.msra.mxu1 %v1899_v24  ;;  %v81_v33 = vld [vmem:[%s2929_s3 + $0x68] sm:$0xff]  ;;  %v1905_v34 = vpack.c.bf16 %v1144_v30, %v1143_v29  ;;  %v1146_v36 = vld [vmem:[%s2929_s3 + $0xb8] sm:$0xff]  ;;  %v82_v38 = vld [vmem:[%s2929_s3 + $0x70] sm:$0xff] }
   0xd   :  { %1882 = vmatpush3.bf16.msra.mxu0 %v1881_v13  ;;  %1901 = vmatprep.subr.bf16.mxu1 %v2175_v8  ;;  %v1893_v37 = vpack.c.bf16 %v81_v33, %v80_v32  ;;  %v83_v39 = vld [vmem:[%s2929_s3 + $0x78] sm:$0xff]  ;;  %v1908_v40 = vpack.c.bf16 %v1146_v36, %v1145_v35  ;;  %v1147_v41 = vld [vmem:[%s2929_s3 + $0xc0] sm:$0xff]  ;;  %v1148_v42 = vld [vmem:[%s2929_s3 + $0xc8] sm:$0xff] }
   0xe   :  { %1883 = vmatprep.subr.bf16.mxu0 %v2175_v8  ;;  %v1896_v43 = vpack.c.bf16 %v83_v39, %v82_v38  ;;  %v1911_v44 = vpack.c.bf16 %v1148_v42, %v1147_v41  ;;  %v1149_v45 = vld [vmem:[%s2929_s3 + $0xd0] sm:$0xff]  ;;  %v1150_v46 = vld [vmem:[%s2929_s3 + $0xd8] sm:$0xff]  ;;  %v1151_v48 = vld [vmem:[%s2929_s3 + $0xe0] sm:$0xff] }
   0xf   :  { %v1914_v47 = vpack.c.bf16 %v1150_v46, %v1149_v45  ;;  %v1152_v49 = vld [vmem:[%s2929_s3 + $0xe8] sm:$0xff]  ;;  %v28_v54 = vld [vmem:[%s2927_s1] sm:$0x7]  ;;  %v1153_v7 = vld [vmem:[%s2929_s3 + $0xf0] sm:$0xff]  ;;  %s2179_s1 = smov [#allocation2]  }
  0x10   :  { %1903 = vmatpush3.bf16.msra.mxu1 %v1902_v28  ;;  %v1917_v50 = vpack.c.bf16 %v1152_v49, %v1151_v48  ;;  %v38_v55 = vrot.slane %v28_v54, %v37_v53  ;;  %v54_v60 = vrot.slane %v28_v54, %v53_v56  ;;  %v64_v61 = vrot.slane %v28_v54, %v63_v57  ;;  %v1137_v62 = vld [vmem:[%s2928_s2] ss:$0 sm:$0xff]  ;;  %v1154_v9 = vld [vmem:[%s2929_s3 + $0xf8] sm:$0xff]  ;;  %v1158_v12 = vld [vmem:[%s2929_s3 + $0x108] sm:$0xff] }
  0x11   :  { %1885 = vmatpush3.bf16.msra.mxu0 %v1884_v16  ;;  %1904 = vmatprep.subr.bf16.mxu1 %v2175_v8  ;;  %v1920_v10 = vpack.c.bf16 %v1154_v9, %v1153_v7  ;;  %v1157_v11 = vld [vmem:[%s2929_s3 + $0x100] sm:$0xff]  ;;  %v1159_v13 = vld [vmem:[%s2929_s3 + $0x110] sm:$0xff]  ;;  %v1160_v15 = vld [vmem:[%s2929_s3 + $0x118] sm:$0xff] }
  0x12   :  { %1886 = vmatprep.subr.bf16.mxu0 %v2175_v8  ;;  %v1923_v14 = vpack.c.bf16 %v1158_v12, %v1157_v11  ;;  %v1926_v16 = vpack.c.bf16 %v1160_v15, %v1159_v13  ;;  %v1161_v17 = vld [vmem:[%s2929_s3 + $0x120] sm:$0xff]  ;;  %v1162_v18 = vld [vmem:[%s2929_s3 + $0x128] sm:$0xff]  ;;  %v1163_v21 = vld [vmem:[%s2929_s3 + $0x130] sm:$0xff] }
  0x13   :  { %v1929_v20 = vpack.c.bf16 %v1162_v18, %v1161_v17  ;;  %v1164_v22 = vld [vmem:[%s2929_s3 + $0x138] sm:$0xff]  ;;  %v1165_v24 = vld [vmem:[%s2929_s3 + $0x140] sm:$0xff]  ;;  %v1166_v25 = vld [vmem:[%s2929_s3 + $0x148] sm:$0xff] }
  0x14   :  { %1906 = vmatpush3.bf16.msra.mxu1 %v1905_v34  ;;  %v1935_v26 = vpack.c.bf16 %v1166_v25, %v1165_v24  ;;  %v1167_v27 = vld [vmem:[%s2929_s3 + $0x150] sm:$0xff]  ;;  %v1168_v28 = vld [vmem:[%s2929_s3 + $0x158] sm:$0xff]  ;;  %v1169_v30 = vld [vmem:[%s2929_s3 + $0x160] sm:$0xff] }
  0x15   :  { %1888 = vmatpush3.bf16.msra.mxu0 %v1887_v23  ;;  %1907 = vmatprep.subr.bf16.mxu1 %v2175_v8  ;;  %v1932_v23 = vpack.c.bf16 %v1164_v22, %v1163_v21  ;;  %v1938_v29 = vpack.c.bf16 %v1168_v28, %v1167_v27  ;;  %v1138_v33 = vld [vmem:[%s2930_s4] ss:$0 sm:$0xff]  ;;  %v1171_v38 = vld [vmem:[%s2929_s3 + $0x170] sm:$0xff]  ;;  %v1172_v39 = vld [vmem:[%s2929_s3 + $0x178] sm:$0xff] }
  0x16   :  { %1889 = vmatprep.subr.bf16.mxu0 %v2175_v8  ;;  %v1175_v41 = vld [vmem:[%s2929_s3 + $0x180] sm:$0xff]  ;;  %v1176_v42 = vld [vmem:[%s2929_s3 + $0x188] sm:$0xff]  ;;  %v1178_v45 = vld [vmem:[%s2929_s3 + $0x198] sm:$0xff] }
  0x17   :  { %v1180_v48 = vld [vmem:[%s2929_s3 + $0x1a8] sm:$0xff]  ;;  %v1182_v51 = vld [vmem:[%s2929_s3 + $0x1b8] sm:$0xff]  ;;  %v1183_v53 = vld [vmem:[%s2929_s3 + $0x1c0] sm:$0xff] }
  0x18   :  { %1909 = vmatpush3.bf16.msra.mxu1 %v1908_v40  ;;  %v1944_v40 = vpack.c.bf16 %v1172_v39, %v1171_v38  ;;  %v1184_v54 = vld [vmem:[%s2929_s3 + $0x1c8] sm:$0xff]  ;;  %v1185_v56 = vld [vmem:[%s2929_s3 + $0x1d0] sm:$0xff]  ;;  %v1186_v57 = vld [vmem:[%s2929_s3 + $0x1d8] sm:$0xff] }
  0x19   :  { %1891 = vmatpush3.bf16.msra.mxu0 %v1890_v31  ;;  %1910 = vmatprep.subr.bf16.mxu1 %v2175_v8  ;;  %v1170_v31 = vld [vmem:[%s2929_s3 + $0x168] sm:$0xff]  ;;  %v1193_v9 = vld [vmem:[%s2929_s3 + $0x200] sm:$0xff]  ;;  %v1195_v11 = vld [vmem:[%s2929_s3 + $0x210] sm:$0xff] }
  0x1a   :  { %1892 = vmatprep.subr.bf16.mxu0 %v2175_v8  ;;  %v1941_v32 = vpack.c.bf16 %v1170_v31, %v1169_v30  ;;  %v1196_v13 = vld [vmem:[%s2929_s3 + $0x218] sm:$0xff]  ;;  %v1197_v15 = vld [vmem:[%s2929_s3 + $0x220] sm:$0xff]  ;;  %v1199_v18 = vld [vmem:[%s2929_s3 + $0x230] sm:$0xff] }
  0x1b   :  { %v1201_v22 = vld [vmem:[%s2929_s3 + $0x240] sm:$0xff]  ;;  %v1203_v25 = vld [vmem:[%s2929_s3 + $0x250] sm:$0xff] }
  0x1c   :  { %1912 = vmatpush3.bf16.msra.mxu1 %v1911_v44  ;;  %v1947_v44 = vpack.c.bf16 %v1176_v42, %v1175_v41  ;;  %v1205_v28 = vld [vmem:[%s2929_s3 + $0x260] sm:$0xff]  ;;  %v1213_v41 = vld [vmem:[%s2929_s3 + $0x290] sm:$0xff] }
  0x1d   :  { %1894 = vmatpush3.bf16.msra.mxu0 %v1893_v37  ;;  %1913 = vmatprep.subr.bf16.mxu1 %v2175_v8  ;;  %v1174_v31 = vld [vmem:[%s2930_s4 + $0x2] ss:$0 sm:$0xff] }
  0x1e   :  { %1895 = vmatprep.subr.bf16.mxu0 %v2175_v8  ;;  %v1211_v39 = vld [vmem:[%s2929_s3 + $0x280] sm:$0xff] }
  0x20   :  { %1915 = vmatpush3.bf16.msra.mxu1 %v1914_v47  ;;  %v1179_v47 = vld [vmem:[%s2929_s3 + $0x1a0] sm:$0xff] }
  0x21   :  { %1897 = vmatpush3.bf16.msra.mxu0 %v1896_v43  ;;  %1916 = vmatprep.subr.bf16.mxu1 %v2175_v8  ;;  %v1177_v43 = vld [vmem:[%s2929_s3 + $0x190] sm:$0xff]  ;;  %v1953_v49 = vpack.c.bf16 %v1180_v48, %v1179_v47 }
  0x22   :  { %1922 = vmatprep.subr.bf16.mxu0 %v2175_v8  ;;  %v1950_v46 = vpack.c.bf16 %v1178_v45, %v1177_v43  ;;  %v1214_v43 = vld [vmem:[%s2929_s3 + $0x298] sm:$0xff]  ;;  %v1215_v45 = vld [vmem:[%s2929_s3 + $0x2a0] sm:$0xff]  ;;  %v1217_v48 = vld [vmem:[%s2929_s3 + $0x2b0] sm:$0xff] }
  0x24   :  { %1918 = vmatpush3.bf16.msra.mxu1 %v1917_v50  ;;  %v1181_v50 = vld [vmem:[%s2929_s3 + $0x1b0] sm:$0xff] }
  0x25   :  { %1919 = vmatprep.subr.bf16.mxu1 %v2175_v8  ;;  %v1956_v52 = vpack.c.bf16 %v1182_v51, %v1181_v50  ;;  %v1219_v51 = vld [vmem:[%s2929_s3 + $0x2c0] sm:$0xff] }
  0x28   :  { %1921 = vmatpush3.bf16.msra.mxu1 %v1920_v10  ;;  %v1194_v10 = vld [vmem:[%s2929_s3 + $0x208] sm:$0xff] }
  0x29   :  { %1946 = vmatprep.subr.bf16.mxu1 %v2175_v8  ;;  %v1971_v12 = vpack.c.bf16 %v1194_v10, %v1193_v9  ;;  %v1231_v9 = vld [vmem:[%s2929_s3 + $0x310] sm:$0xff] }
  0x81   :  { %v33_v58 = vpop.permute.xlu0 %32  ;;  %v59_v63 = vpop.permute.xlu1 %58 }
  0x82   :  { %v39_v59 = vmul.f32 %v38_v55, %v33_v58  ;;  %v65_v3 = vmul.f32 %v64_v61, %v59_v63  ;;  %v1959_v55 = vpack.c.bf16 %v1184_v54, %v1183_v53  ;;  %v1962_v58 = vpack.c.bf16 %v1186_v57, %v1185_v56  ;;  %v1221_v54 = vld [vmem:[%s2929_s3 + $0x2d0] sm:$0xff]  ;;  %v1192_v57 = vld [vmem:[%s2930_s4 + $0x3] ss:$0 sm:$0xff] }
  0x84   :  { %v46_v1 = vadd.f32 %v1137_v62, %v39_v59  ;;  %v1187_v59 = vld [vmem:[%s2929_s3 + $0x1e0] sm:$0xff] }
  0x85   :  { %v1156_v62 = vld [vmem:[%s2930_s4 + $0x1] ss:$0 sm:$0xff] }
  0x86   :  { %v49_v0 = vpop.permute.xlu0 %48 }
  0x87   :  { %v55_v2 = vmul.f32 %v54_v60, %v49_v0  ;;  %v1188_v60 = vld [vmem:[%s2929_s3 + $0x1e8] sm:$0xff] }
  0x88   :  { %v1965_v61 = vpack.c.bf16 %v1188_v60, %v1187_v59 }
  0x89   :  { %v56_v4 = vadd.f32 %v55_v2, %v46_v1 }
  0x8b   :  { %v2340_v5 = vadd.f32 %v65_v3, %v56_v4  ;;  %v1189_v3 = vld [vmem:[%s2929_s3 + $0x1f0] sm:$0xff]  ;;  %v1190_v4 = vld [vmem:[%s2929_s3 + $0x1f8] sm:$0xff] }
  0x8c   :  { %v1968_v7 = vpack.c.bf16 %v1190_v4, %v1189_v3  ;;  %v1229_v4 = vld [vmem:[%s2929_s3 + $0x300] sm:$0xff] }
  0x8d   :  { %v67_v6 = vmax.f32 %v2340_v5, 0.0  ;;  %v1247_v5 = vld [vmem:[%s2929_s3 + $0x380] sm:$0xff] }
  0x8f   :  { %1522 = vmatmul.mubr.f32.vlgmr.msra.gmra.mrb[0].mxu0 %v67_v6 }
  0x90   :  { %1591 = vmatprep.mubr.msk.f32.mxu0 %vm2177_vm0, %v2178_v19  ;;  %1924 = vmatpush3.bf16.msra.mxu0 %v1923_v14  ;;  %v1974_v14 = vpack.c.bf16 %v1196_v13, %v1195_v11  ;;  %v1232_v11 = vld [vmem:[%s2929_s3 + $0x318] sm:$0xff]  ;;  %v1233_v13 = vld [vmem:[%s2929_s3 + $0x320] sm:$0xff] }
  0x91   :  { %1925 = vmatprep.subr.bf16.mxu0 %v2175_v8 }
  0x94   :  { %1927 = vmatpush3.bf16.msra.mxu0 %v1926_v16  ;;  %v1198_v16 = vld [vmem:[%s2929_s3 + $0x228] sm:$0xff] }
  0x95   :  { %1928 = vmatprep.subr.bf16.mxu0 %v2175_v8  ;;  %v1977_v17 = vpack.c.bf16 %v1198_v16, %v1197_v15  ;;  %v1235_v16 = vld [vmem:[%s2929_s3 + $0x330] sm:$0xff] }
  0x98   :  { %1930 = vmatpush3.bf16.msra.mxu0 %v1929_v20  ;;  %v1200_v20 = vld [vmem:[%s2929_s3 + $0x238] sm:$0xff] }
  0x99   :  { %1931 = vmatprep.subr.bf16.mxu0 %v2175_v8  ;;  %v1980_v21 = vpack.c.bf16 %v1200_v20, %v1199_v18  ;;  %v1237_v20 = vld [vmem:[%s2929_s3 + $0x340] sm:$0xff] }
  0x9c   :  { %1933 = vmatpush3.bf16.msra.mxu0 %v1932_v23  ;;  %v1202_v23 = vld [vmem:[%s2929_s3 + $0x248] sm:$0xff] }
  0x9d   :  { %1934 = vmatprep.subr.bf16.mxu0 %v2175_v8  ;;  %v1983_v24 = vpack.c.bf16 %v1202_v23, %v1201_v22  ;;  %v1239_v23 = vld [vmem:[%s2929_s3 + $0x350] sm:$0xff] }
  0xa0   :  { %1936 = vmatpush3.bf16.msra.mxu0 %v1935_v26  ;;  %v1204_v26 = vld [vmem:[%s2929_s3 + $0x258] sm:$0xff] }
  0xa1   :  { %1937 = vmatprep.subr.bf16.mxu0 %v2175_v8  ;;  %v1986_v27 = vpack.c.bf16 %v1204_v26, %v1203_v25  ;;  %v1241_v26 = vld [vmem:[%s2929_s3 + $0x360] sm:$0xff] }
  0xa4   :  { %1939 = vmatpush3.bf16.msra.mxu0 %v1938_v29  ;;  %v1206_v29 = vld [vmem:[%s2929_s3 + $0x268] sm:$0xff] }
  0xa5   :  { %1940 = vmatprep.subr.bf16.mxu0 %v2175_v8  ;;  %v1989_v30 = vpack.c.bf16 %v1206_v29, %v1205_v28  ;;  %v1210_v29 = vld [vmem:[%s2930_s4 + $0x4] ss:$0 sm:$0xff] }
  0xa8   :  { %1942 = vmatpush3.bf16.msra.mxu0 %v1941_v32 }
  0xa9   :  { %1943 = vmatprep.subr.bf16.mxu0 %v2175_v8 }
  0xac   :  { %1945 = vmatpush3.bf16.msra.mxu0 %v1944_v40  ;;  %v1212_v40 = vld [vmem:[%s2929_s3 + $0x288] sm:$0xff] }
  0xad   :  { %1970 = vmatprep.subr.bf16.mxu0 %v2175_v8  ;;  %v1995_v42 = vpack.c.bf16 %v1212_v40, %v1211_v39  ;;  %v1250_v40 = vld [vmem:[%s2929_s3 + $0x398] sm:$0xff] }
 0x162   :  { %v157_v34 = vpop.f32.mrb[0].mxu0 }
 0x163   :  { %v158_v35 = vadd.f32 %v1138_v33, %v157_v34  ;;  %v1523_v36 = vpop.f32.mrb[1].mxu0 }
 0x164   :  { %v1207_v36 = vld [vmem:[%s2929_s3 + $0x270] sm:$0xff] }
 0x165   :  { %v161_v37 = vmax.f32 %v158_v35, 0.0 }
 0x167   :  { %1557 = vmatmul.mubr.f32.vlgmr.msra.gmra.mrb[0].mxu1 %v161_v37  ;;  %v1208_v37 = vld [vmem:[%s2929_s3 + $0x278] sm:$0xff] }
 0x168   :  { %1626 = vmatprep.mubr.msk.f32.mxu1 %vm2177_vm0, %v2178_v19  ;;  %1948 = vmatpush3.bf16.msra.mxu1 %v1947_v44  ;;  %v1992_v38 = vpack.c.bf16 %v1208_v37, %v1207_v36  ;;  %v1998_v44 = vpack.c.bf16 %v1214_v43, %v1213_v41  ;;  %v1244_v36 = vld [vmem:[%s2929_s3 + $0x378] sm:$0xff]  ;;  %v1252_v43 = vld [vmem:[%s2929_s3 + $0x3a8] sm:$0xff] }
 0x169   :  { %1949 = vmatprep.subr.bf16.mxu1 %v2175_v8 }
 0x16c   :  { %1951 = vmatpush3.bf16.msra.mxu1 %v1950_v46  ;;  %v1216_v46 = vld [vmem:[%s2929_s3 + $0x2a8] sm:$0xff] }
 0x16d   :  { %1952 = vmatprep.subr.bf16.mxu1 %v2175_v8  ;;  %v2001_v47 = vpack.c.bf16 %v1216_v46, %v1215_v45  ;;  %v1253_v45 = vld [vmem:[%s2929_s3 + $0x3b0] sm:$0xff]  ;;  %v1254_v46 = vld [vmem:[%s2929_s3 + $0x3b8] sm:$0xff] }
 0x170   :  { %1954 = vmatpush3.bf16.msra.mxu1 %v1953_v49  ;;  %v1218_v49 = vld [vmem:[%s2929_s3 + $0x2b8] sm:$0xff] }
 0x171   :  { %1955 = vmatprep.subr.bf16.mxu1 %v2175_v8  ;;  %v2004_v50 = vpack.c.bf16 %v1218_v49, %v1217_v48  ;;  %v1255_v48 = vld [vmem:[%s2929_s3 + $0x3c0] sm:$0xff]  ;;  %v1256_v49 = vld [vmem:[%s2929_s3 + $0x3c8] sm:$0xff] }
 0x174   :  { %1957 = vmatpush3.bf16.msra.mxu1 %v1956_v52  ;;  %v1220_v52 = vld [vmem:[%s2929_s3 + $0x2c8] sm:$0xff] }
 0x175   :  { %1958 = vmatprep.subr.bf16.mxu1 %v2175_v8  ;;  %v2007_v53 = vpack.c.bf16 %v1220_v52, %v1219_v51  ;;  %v1257_v51 = vld [vmem:[%s2929_s3 + $0x3d0] sm:$0xff]  ;;  %v1258_v52 = vld [vmem:[%s2929_s3 + $0x3d8] sm:$0xff] }
 0x178   :  { %1960 = vmatpush3.bf16.msra.mxu1 %v1959_v55  ;;  %v1222_v55 = vld [vmem:[%s2929_s3 + $0x2d8] sm:$0xff] }
 0x179   :  { %1961 = vmatprep.subr.bf16.mxu1 %v2175_v8  ;;  %v2010_v56 = vpack.c.bf16 %v1222_v55, %v1221_v54  ;;  %v1259_v54 = vld [vmem:[%s2929_s3 + $0x3e0] sm:$0xff]  ;;  %v1260_v55 = vld [vmem:[%s2929_s3 + $0x3e8] sm:$0xff] }
 0x17c   :  { %1963 = vmatpush3.bf16.msra.mxu1 %v1962_v58 }
 0x17d   :  { %1964 = vmatprep.subr.bf16.mxu1 %v2175_v8 }
 0x180   :  { %1966 = vmatpush3.bf16.msra.mxu1 %v1965_v61 }
 0x181   :  { %1967 = vmatprep.subr.bf16.mxu1 %v2175_v8 }
 0x184   :  { %1969 = vmatpush3.bf16.msra.mxu1 %v1968_v7  ;;  %v1230_v7 = vld [vmem:[%s2929_s3 + $0x308] sm:$0xff] }
 0x185   :  { %1994 = vmatprep.subr.bf16.mxu1 %v2175_v8  ;;  %v2019_v10 = vpack.c.bf16 %v1230_v7, %v1229_v4  ;;  %v1268_v7 = vld [vmem:[%s2929_s3 + $0x418] sm:$0xff] }
 0x23a   :  { %v253_v63 = vpop.f32.mrb[0].mxu1 }
 0x23b   :  { %v254_v0 = vadd.f32 %v1156_v62, %v253_v63  ;;  %v1558_v1 = vpop.f32.mrb[1].mxu1  ;;  %v1223_v62 = vld [vmem:[%s2929_s3 + $0x2e0] sm:$0xff]  ;;  %v1224_v63 = vld [vmem:[%s2929_s3 + $0x2e8] sm:$0xff] }
 0x23c   :  { %v1225_v1 = vld [vmem:[%s2929_s3 + $0x2f0] sm:$0xff] }
 0x23d   :  { %v257_v2 = vmax.f32 %v254_v0, 0.0  ;;  %v2013_v0 = vpack.c.bf16 %v1224_v63, %v1223_v62  ;;  %v1261_v62 = vld [vmem:[%s2929_s3 + $0x3f0] sm:$0xff]  ;;  %v1262_v63 = vld [vmem:[%s2929_s3 + $0x3f8] sm:$0xff] }
 0x23f   :  { %1592 = vmatmul.mubr.f32.vlgmr.msra.gmra.mrb[2].mxu0 %v257_v2  ;;  %v1226_v2 = vld [vmem:[%s2929_s3 + $0x2f8] sm:$0xff] }
 0x240   :  { %1661 = vmatprep.mubr.msk.f32.mxu0 %vm2177_vm0, %v2178_v19  ;;  %1972 = vmatpush3.bf16.msra.mxu0 %v1971_v12  ;;  %v2016_v3 = vpack.c.bf16 %v1226_v2, %v1225_v1  ;;  %v2022_v12 = vpack.c.bf16 %v1232_v11, %v1231_v9  ;;  %v1265_v1 = vld [vmem:[%s2929_s3 + $0x400] sm:$0xff]  ;;  %v1266_v2 = vld [vmem:[%s2929_s3 + $0x408] sm:$0xff] }
 0x241   :  { %1973 = vmatprep.subr.bf16.mxu0 %v2175_v8  ;;  %v2067_v4 = vpack.c.bf16 %v1266_v2, %v1265_v1  ;;  %v1270_v11 = vld [vmem:[%s2929_s3 + $0x428] sm:$0xff]  ;;  %v1031_v2 = vld [vmem:[%s2931_s5 + $0x18] sm:$0xff] }
 0x244   :  { %1975 = vmatpush3.bf16.msra.mxu0 %v1974_v14  ;;  %v1234_v14 = vld [vmem:[%s2929_s3 + $0x328] sm:$0xff] }
 0x245   :  { %1976 = vmatprep.subr.bf16.mxu0 %v2175_v8  ;;  %v2025_v15 = vpack.c.bf16 %v1234_v14, %v1233_v13  ;;  %v1271_v13 = vld [vmem:[%s2929_s3 + $0x430] sm:$0xff]  ;;  %v1272_v14 = vld [vmem:[%s2929_s3 + $0x438] sm:$0xff] }
 0x248   :  { %1978 = vmatpush3.bf16.msra.mxu0 %v1977_v17  ;;  %v1236_v17 = vld [vmem:[%s2929_s3 + $0x338] sm:$0xff] }
 0x249   :  { %1979 = vmatprep.subr.bf16.mxu0 %v2175_v8  ;;  %v2028_v18 = vpack.c.bf16 %v1236_v17, %v1235_v16  ;;  %v1273_v16 = vld [vmem:[%s2929_s3 + $0x440] sm:$0xff]  ;;  %v1274_v17 = vld [vmem:[%s2929_s3 + $0x448] sm:$0xff] }
 0x24c   :  { %1981 = vmatpush3.bf16.msra.mxu0 %v1980_v21  ;;  %v1238_v21 = vld [vmem:[%s2929_s3 + $0x348] sm:$0xff] }
 0x24d   :  { %1982 = vmatprep.subr.bf16.mxu0 %v2175_v8  ;;  %v2031_v22 = vpack.c.bf16 %v1238_v21, %v1237_v20  ;;  %v1275_v20 = vld [vmem:[%s2929_s3 + $0x450] sm:$0xff]  ;;  %v1276_v21 = vld [vmem:[%s2929_s3 + $0x458] sm:$0xff] }
 0x250   :  { %1984 = vmatpush3.bf16.msra.mxu0 %v1983_v24  ;;  %v1240_v24 = vld [vmem:[%s2929_s3 + $0x358] sm:$0xff] }
 0x251   :  { %1985 = vmatprep.subr.bf16.mxu0 %v2175_v8  ;;  %v2034_v25 = vpack.c.bf16 %v1240_v24, %v1239_v23  ;;  %v1277_v23 = vld [vmem:[%s2929_s3 + $0x460] sm:$0xff]  ;;  %v1278_v24 = vld [vmem:[%s2929_s3 + $0x468] sm:$0xff] }
 0x254   :  { %1987 = vmatpush3.bf16.msra.mxu0 %v1986_v27  ;;  %v1242_v27 = vld [vmem:[%s2929_s3 + $0x368] sm:$0xff] }
 0x255   :  { %1988 = vmatprep.subr.bf16.mxu0 %v2175_v8  ;;  %v2037_v28 = vpack.c.bf16 %v1242_v27, %v1241_v26  ;;  %v1246_v26 = vld [vmem:[%s2930_s4 + $0x6] ss:$0 sm:$0xff] }
 0x258   :  { %1990 = vmatpush3.bf16.msra.mxu0 %v1989_v30 }
 0x259   :  { %1991 = vmatprep.subr.bf16.mxu0 %v2175_v8 }
 0x25c   :  { %1993 = vmatpush3.bf16.msra.mxu0 %v1992_v38  ;;  %v1249_v38 = vld [vmem:[%s2929_s3 + $0x390] sm:$0xff] }
 0x25d   :  { %2018 = vmatprep.subr.bf16.mxu0 %v2175_v8  ;;  %v2046_v41 = vpack.c.bf16 %v1250_v40, %v1249_v38  ;;  %v1286_v38 = vld [vmem:[%s2929_s3 + $0x498] sm:$0xff]  ;;  %v1287_v40 = vld [vmem:[%s2929_s3 + $0x4a0] sm:$0xff] }
 0x312   :  { %v349_v32 = vpop.f32.mrb[2].mxu0 }
 0x313   :  { %v350_v33 = vadd.f32 %v1174_v31, %v349_v32  ;;  %v1593_v34 = vpop.f32.mrb[3].mxu0 }
 0x315   :  { %v353_v35 = vmax.f32 %v350_v33, 0.0 }
 0x317   :  { %1627 = vmatmul.mubr.f32.vlgmr.msra.gmra.mrb[2].mxu1 %v353_v35  ;;  %v1243_v35 = vld [vmem:[%s2929_s3 + $0x370] sm:$0xff] }
 0x318   :  { %1696 = vmatprep.mubr.msk.f32.mxu1 %vm2177_vm0, %v2178_v19  ;;  %1996 = vmatpush3.bf16.msra.mxu1 %v1995_v42  ;;  %v2040_v37 = vpack.c.bf16 %v1244_v36, %v1243_v35  ;;  %v1251_v42 = vld [vmem:[%s2929_s3 + $0x3a0] sm:$0xff] }
 0x319   :  { %1997 = vmatprep.subr.bf16.mxu1 %v2175_v8  ;;  %v1283_v36 = vld [vmem:[%s2929_s3 + $0x480] sm:$0xff] }
 0x31c   :  { %1999 = vmatpush3.bf16.msra.mxu1 %v1998_v44  ;;  %v2049_v44 = vpack.c.bf16 %v1252_v43, %v1251_v42  ;;  %v1289_v43 = vld [vmem:[%s2929_s3 + $0x4b0] sm:$0xff] }
 0x31d   :  { %2000 = vmatprep.subr.bf16.mxu1 %v2175_v8 }
 0x320   :  { %2002 = vmatpush3.bf16.msra.mxu1 %v2001_v47  ;;  %v2052_v47 = vpack.c.bf16 %v1254_v46, %v1253_v45  ;;  %v1291_v46 = vld [vmem:[%s2929_s3 + $0x4c0] sm:$0xff] }
 0x321   :  { %2003 = vmatprep.subr.bf16.mxu1 %v2175_v8 }
 0x324   :  { %2005 = vmatpush3.bf16.msra.mxu1 %v2004_v50  ;;  %v2055_v50 = vpack.c.bf16 %v1256_v49, %v1255_v48  ;;  %v1293_v49 = vld [vmem:[%s2929_s3 + $0x4d0] sm:$0xff] }
 0x325   :  { %2006 = vmatprep.subr.bf16.mxu1 %v2175_v8 }
 0x328   :  { %2008 = vmatpush3.bf16.msra.mxu1 %v2007_v53  ;;  %v2058_v53 = vpack.c.bf16 %v1258_v52, %v1257_v51  ;;  %v1295_v52 = vld [vmem:[%s2929_s3 + $0x4e0] sm:$0xff] }
 0x329   :  { %2009 = vmatprep.subr.bf16.mxu1 %v2175_v8 }
 0x32c   :  { %2011 = vmatpush3.bf16.msra.mxu1 %v2010_v56  ;;  %v2061_v56 = vpack.c.bf16 %v1260_v55, %v1259_v54  ;;  %v1264_v55 = vld [vmem:[%s2930_s4 + $0x7] ss:$0 sm:$0xff] }
 0x32d   :  { %2012 = vmatprep.subr.bf16.mxu1 %v2175_v8 }
 0x330   :  { %2014 = vmatpush3.bf16.msra.mxu1 %v2013_v0  ;;  %v2064_v0 = vpack.c.bf16 %v1262_v63, %v1261_v62  ;;  %v1028_v63 = vld [vmem:[%s2931_s5] sm:$0xff] }
 0x331   :  { %2015 = vmatprep.subr.bf16.mxu1 %v2175_v8 }
 0x334   :  { %2017 = vmatpush3.bf16.msra.mxu1 %v2016_v3  ;;  %v1267_v3 = vld [vmem:[%s2929_s3 + $0x410] sm:$0xff] }
 0x335   :  { %2042 = vmatprep.subr.bf16.mxu1 %v2175_v8  ;;  %v2070_v9 = vpack.c.bf16 %v1268_v7, %v1267_v3  ;;  %v1033_v7 = vld [vmem:[%s2931_s5 + $0x28] sm:$0xff] }
 0x3ea   :  { %v445_v58 = vpop.f32.mrb[2].mxu1 }
 0x3eb   :  { %v446_v59 = vadd.f32 %v1192_v57, %v445_v58  ;;  %v1628_v60 = vpop.f32.mrb[3].mxu1  ;;  %v1228_v57 = vld [vmem:[%s2930_s4 + $0x5] ss:$0 sm:$0xff] }
 0x3ed   :  { %v449_v61 = vmax.f32 %v446_v59, 0.0 }
 0x3ef   :  { %1662 = vmatmul.mubr.f32.vlgmr.msra.gmra.mrb[4].mxu0 %v449_v61 }
 0x3f0   :  { %1731 = vmatprep.mubr.msk.f32.mxu0 %vm2177_vm0, %v2178_v19  ;;  %2020 = vmatpush3.bf16.msra.mxu0 %v2019_v10  ;;  %v1269_v10 = vld [vmem:[%s2929_s3 + $0x420] sm:$0xff] }
 0x3f1   :  { %2021 = vmatprep.subr.bf16.mxu0 %v2175_v8 }
 0x3f4   :  { %2023 = vmatpush3.bf16.msra.mxu0 %v2022_v12  ;;  %v2073_v12 = vpack.c.bf16 %v1270_v11, %v1269_v10  ;;  %v1034_v10 = vld [vmem:[%s2931_s5 + $0x30] sm:$0xff]  ;;  %v1035_v11 = vld [vmem:[%s2931_s5 + $0x38] sm:$0xff] }
 0x3f5   :  { %2024 = vmatprep.subr.bf16.mxu0 %v2175_v8 }
 0x3f8   :  { %2026 = vmatpush3.bf16.msra.mxu0 %v2025_v15  ;;  %v2076_v15 = vpack.c.bf16 %v1272_v14, %v1271_v13  ;;  %v1036_v13 = vld [vmem:[%s2931_s5 + $0x40] sm:$0xff]  ;;  %v1037_v14 = vld [vmem:[%s2931_s5 + $0x48] sm:$0xff] }
 0x3f9   :  { %2027 = vmatprep.subr.bf16.mxu0 %v2175_v8 }
 0x3fc   :  { %2029 = vmatpush3.bf16.msra.mxu0 %v2028_v18  ;;  %v2079_v18 = vpack.c.bf16 %v1274_v17, %v1273_v16  ;;  %v1038_v16 = vld [vmem:[%s2931_s5 + $0x50] sm:$0xff]  ;;  %v1039_v17 = vld [vmem:[%s2931_s5 + $0x58] sm:$0xff] }
 0x3fd   :  { %2030 = vmatprep.subr.bf16.mxu0 %v2175_v8 }
 0x400   :  { %2032 = vmatpush3.bf16.msra.mxu0 %v2031_v22  ;;  %v2082_v22 = vpack.c.bf16 %v1276_v21, %v1275_v20  ;;  %v1282_v20 = vld [vmem:[%s2930_s4 + $0x8] ss:$0 sm:$0xff] }
 0x401   :  { %2033 = vmatprep.subr.bf16.mxu0 %v2175_v8 }
 0x404   :  { %2035 = vmatpush3.bf16.msra.mxu0 %v2034_v25  ;;  %v2085_v25 = vpack.c.bf16 %v1278_v24, %v1277_v23 }
 0x405   :  { %2036 = vmatprep.subr.bf16.mxu0 %v2175_v8 }
 0x408   :  { %2038 = vmatpush3.bf16.msra.mxu0 %v2037_v28 }
 0x409   :  { %2039 = vmatprep.subr.bf16.mxu0 %v2175_v8 }
 0x40c   :  { %2041 = vmatpush3.bf16.msra.mxu0 %v2040_v37  ;;  %v1284_v37 = vld [vmem:[%s2929_s3 + $0x488] sm:$0xff] }
 0x40d   :  { %2066 = vmatprep.subr.bf16.mxu0 %v2175_v8 }
 0x4c2   :  { %v541_v30 = vpop.f32.mrb[4].mxu0 }
 0x4c3   :  { %v542_v31 = vadd.f32 %v1210_v29, %v541_v30  ;;  %v1663_v32 = vpop.f32.mrb[5].mxu0 }
 0x4c4   :  { %v1280_v32 = vld [vmem:[%s2929_s3 + $0x478] sm:$0xff] }
 0x4c5   :  { %v2652_v33 = vadd.f32 %v542_v31, %v67_v6  ;;  %v1248_v6 = vld [vmem:[%s2929_s3 + $0x388] sm:$0xff]  ;;  %v1279_v31 = vld [vmem:[%s2929_s3 + $0x470] sm:$0xff] }
 0x4c6   :  { %v2043_v39 = vpack.c.bf16 %v1248_v6, %v1247_v5  ;;  %v2088_v35 = vpack.c.bf16 %v1280_v32, %v1279_v31  ;;  %v1285_v5 = vld [vmem:[%s2929_s3 + $0x490] sm:$0xff]  ;;  %v2091_v6 = vpack.c.bf16 %v1284_v37, %v1283_v36  ;;  %v1300_v31 = vld [vmem:[%s2930_s4 + $0x9] ss:$0 sm:$0xff] }
 0x4c7   :  { %v546_v34 = vmax.f32 %v2652_v33, 0.0 }
 0x4c9   :  { %1697 = vmatmul.mubr.f32.vlgmr.msra.gmra.mrb[4].mxu1 %v546_v34 }
 0x4ca   :  { %1766 = vmatprep.mubr.msk.f32.mxu1 %vm2177_vm0, %v2178_v19  ;;  %2044 = vmatpush3.bf16.msra.mxu1 %v2043_v39  ;;  %v2094_v39 = vpack.c.bf16 %v1286_v38, %v1285_v5  ;;  %v1301_v5 = vld [vmem:[%s2932_s6] ss:$0 sm:$0xff] }
 0x4cb   :  { %2045 = vmatprep.subr.bf16.mxu1 %v2175_v8 }
 0x4ce   :  { %2047 = vmatpush3.bf16.msra.mxu1 %v2046_v41  ;;  %v1288_v41 = vld [vmem:[%s2929_s3 + $0x4a8] sm:$0xff] }
 0x4cf   :  { %2048 = vmatprep.subr.bf16.mxu1 %v2175_v8  ;;  %v2097_v42 = vpack.c.bf16 %v1288_v41, %v1287_v40 }
 0x4d2   :  { %2050 = vmatpush3.bf16.msra.mxu1 %v2049_v44  ;;  %v1290_v44 = vld [vmem:[%s2929_s3 + $0x4b8] sm:$0xff] }
 0x4d3   :  { %2051 = vmatprep.subr.bf16.mxu1 %v2175_v8  ;;  %v2100_v45 = vpack.c.bf16 %v1290_v44, %v1289_v43 }
 0x4d6   :  { %2053 = vmatpush3.bf16.msra.mxu1 %v2052_v47  ;;  %v1292_v47 = vld [vmem:[%s2929_s3 + $0x4c8] sm:$0xff] }
 0x4d7   :  { %2054 = vmatprep.subr.bf16.mxu1 %v2175_v8  ;;  %v2103_v48 = vpack.c.bf16 %v1292_v47, %v1291_v46 }
 0x4da   :  { %2056 = vmatpush3.bf16.msra.mxu1 %v2055_v50  ;;  %v1294_v50 = vld [vmem:[%s2929_s3 + $0x4d8] sm:$0xff] }
 0x4db   :  { %2057 = vmatprep.subr.bf16.mxu1 %v2175_v8  ;;  %v2106_v51 = vpack.c.bf16 %v1294_v50, %v1293_v49 }
 0x4de   :  { %2059 = vmatpush3.bf16.msra.mxu1 %v2058_v53  ;;  %v1296_v53 = vld [vmem:[%s2929_s3 + $0x4e8] sm:$0xff] }
 0x4df   :  { %2060 = vmatprep.subr.bf16.mxu1 %v2175_v8  ;;  %v2109_v54 = vpack.c.bf16 %v1296_v53, %v1295_v52 }
 0x4e2   :  { %2062 = vmatpush3.bf16.msra.mxu1 %v2061_v56 }
 0x4e3   :  { %2063 = vmatprep.subr.bf16.mxu1 %v2175_v8 }
 0x4e6   :  { %2065 = vmatpush3.bf16.msra.mxu1 %v2064_v0  ;;  %v1029_v0 = vld [vmem:[%s2931_s5 + $0x8] sm:$0xff] }
 0x4e7   :  { %2090 = vmatprep.subr.bf16.mxu1 %v2175_v8  ;;  %v2115_v1 = vpack.c.bf16 %v1029_v0, %v1028_v63 }
 0x59c   :  { %v638_v58 = vpop.f32.mrb[4].mxu1 }
 0x59d   :  { %v639_v59 = vadd.f32 %v1228_v57, %v638_v58  ;;  %v1698_v60 = vpop.f32.mrb[5].mxu1 }
 0x59e   :  { %v1297_v60 = vld [vmem:[%s2929_s3 + $0x4f0] sm:$0xff] }
 0x59f   :  { %v642_v61 = vmax.f32 %v639_v59, 0.0 }
 0x5a1   :  { %1732 = vmatmul.mubr.f32.vlgmr.msra.gmra.mrb[6].mxu0 %v642_v61  ;;  %v1298_v61 = vld [vmem:[%s2929_s3 + $0x4f8] sm:$0xff] }
 0x5a2   :  { %1801 = vmatprep.mubr.msk.f32.mxu0 %vm2177_vm0, %v2178_v19  ;;  %2068 = vmatpush3.bf16.msra.mxu0 %v2067_v4  ;;  %v2112_v62 = vpack.c.bf16 %v1298_v61, %v1297_v60  ;;  %v1032_v4 = vld [vmem:[%s2931_s5 + $0x20] sm:$0xff] }
 0x5a3   :  { %2069 = vmatprep.subr.bf16.mxu0 %v2175_v8 }
 0x5a6   :  { %2071 = vmatpush3.bf16.msra.mxu0 %v2070_v9  ;;  %v2121_v9 = vpack.c.bf16 %v1033_v7, %v1032_v4 }
 0x5a7   :  { %2072 = vmatprep.subr.bf16.mxu0 %v2175_v8 }
 0x5aa   :  { %2074 = vmatpush3.bf16.msra.mxu0 %v2073_v12  ;;  %v2124_v12 = vpack.c.bf16 %v1035_v11, %v1034_v10 }
 0x5ab   :  { %2075 = vmatprep.subr.bf16.mxu0 %v2175_v8 }
 0x5ae   :  { %2077 = vmatpush3.bf16.msra.mxu0 %v2076_v15  ;;  %v2127_v15 = vpack.c.bf16 %v1037_v14, %v1036_v13 }
 0x5af   :  { %2078 = vmatprep.subr.bf16.mxu0 %v2175_v8 }
 0x5b2   :  { %2080 = vmatpush3.bf16.msra.mxu0 %v2079_v18  ;;  %v2130_v18 = vpack.c.bf16 %v1039_v17, %v1038_v16 }
 0x5b3   :  { %2081 = vmatprep.subr.bf16.mxu0 %v2175_v8 }
 0x5b6   :  { %2083 = vmatpush3.bf16.msra.mxu0 %v2082_v22 }
 0x5b7   :  { %2084 = vmatprep.subr.bf16.mxu0 %v2175_v8 }
 0x5ba   :  { %2086 = vmatpush3.bf16.msra.mxu0 %v2085_v25  ;;  %v1040_v25 = vld [vmem:[%s2931_s5 + $0x60] sm:$0xff] }
 0x5bb   :  { %2087 = vmatprep.subr.bf16.mxu0 %v2175_v8 }
 0x5be   :  { %2089 = vmatpush3.bf16.msra.mxu0 %v2088_v35 }
 0x5bf   :  { %2114 = vmatprep.subr.bf16.mxu0 %v2175_v8 }
 0x674   :  { %v734_v27 = vpop.f32.mrb[6].mxu0 }
 0x675   :  { %v735_v28 = vadd.f32 %v1246_v26, %v734_v27  ;;  %v1733_v29 = vpop.f32.mrb[7].mxu0  ;;  %v1041_v26 = vld [vmem:[%s2931_s5 + $0x68] sm:$0xff] }
 0x676   :  { %v2133_v27 = vpack.c.bf16 %v1041_v26, %v1040_v25  ;;  %v1043_v29 = vld [vmem:[%s2931_s5 + $0x78] sm:$0xff] }
 0x677   :  { %v738_v30 = vmax.f32 %v735_v28, 0.0  ;;  %v1042_v28 = vld [vmem:[%s2931_s5 + $0x70] sm:$0xff] }
 0x679   :  { %1767 = vmatmul.mubr.f32.vlgmr.msra.gmra.mrb[6].mxu1 %v738_v30  ;;  %v2136_v30 = vpack.c.bf16 %v1043_v29, %v1042_v28 }
 0x67a   :  { %1836 = vmatprep.mubr.msk.f32.mxu1 %vm2177_vm0, %v2178_v19  ;;  %2092 = vmatpush3.bf16.msra.mxu1 %v2091_v6 }
 0x67b   :  { %2093 = vmatprep.subr.bf16.mxu1 %v2175_v8 }
 0x67e   :  { %2095 = vmatpush3.bf16.msra.mxu1 %v2094_v39 }
 0x67f   :  { %2096 = vmatprep.subr.bf16.mxu1 %v2175_v8 }
 0x682   :  { %2098 = vmatpush3.bf16.msra.mxu1 %v2097_v42 }
 0x683   :  { %2099 = vmatprep.subr.bf16.mxu1 %v2175_v8 }
 0x686   :  { %2101 = vmatpush3.bf16.msra.mxu1 %v2100_v45 }
 0x687   :  { %2102 = vmatprep.subr.bf16.mxu1 %v2175_v8 }
 0x68a   :  { %2104 = vmatpush3.bf16.msra.mxu1 %v2103_v48 }
 0x68b   :  { %2105 = vmatprep.subr.bf16.mxu1 %v2175_v8 }
 0x68e   :  { %2107 = vmatpush3.bf16.msra.mxu1 %v2106_v51 }
 0x68f   :  { %2108 = vmatprep.subr.bf16.mxu1 %v2175_v8 }
 0x692   :  { %2110 = vmatpush3.bf16.msra.mxu1 %v2109_v54 }
 0x693   :  { %2111 = vmatprep.subr.bf16.mxu1 %v2175_v8 }
 0x696   :  { %2113 = vmatpush3.bf16.msra.mxu1 %v2112_v62 }
 0x74c   :  { %v830_v56 = vpop.f32.mrb[6].mxu1 }
 0x74d   :  { %v831_v57 = vadd.f32 %v1264_v55, %v830_v56  ;;  %v1768_v58 = vpop.f32.mrb[7].mxu1 }
 0x74f   :  { %v834_v59 = vmax.f32 %v831_v57, 0.0 }
 0x751   :  { %1802 = vmatmul.mubr.f32.vlgmr.msra.gmra.mrb[8].mxu0 %v834_v59 }
 0x752   :  { %1871 = vmatprep.mubr.msk.f32.mxu0 %vm2177_vm0, %v2178_v19  ;;  %v1030_v19 = vld [vmem:[%s2931_s5 + $0x10] sm:$0xff]  ;;  %2116 = vmatpush3.bf16.msra.mxu0 %v2115_v1  ;;  %s1129_s5 = sshll.u32 %s2179_s1, 4  ;;  %s1130_s5 = int_to_ptr.vmem [resolvable:$true] %s1129_s5 }
 0x753   :  { %v2118_v3 = vpack.c.bf16 %v1031_v2, %v1030_v19  ;;  %2117 = vmatprep.subr.bf16.mxu0 %v2175_v8  ;;  %s2149_s4 = scalar_lea.vmem %s1130_s5, 128  ;;  %p2154_p1 = scmp.lt.s32.totalorder %s1130_s5, %s1130_s5 }
 0x754   :  { %p2150_p0 = scmp.ne.s32.totalorder %s1130_s5, %s2149_s4  ;;  %p2155_p2 = scmp.lt.s32.totalorder %s2149_s4, %s2149_s4 }
 0x756   :  { %2119 = vmatpush3.bf16.msra.mxu0 %v2118_v3  ;;  %p2156_p3 = por %p2155_p2, %p2154_p1 }
 0x757   :  { %2120 = vmatprep.subr.bf16.mxu0 %v2175_v8 }
 0x758   :  { %p2157_p4 = pnand %p2156_p3, %p2150_p0 }
 0x75a   :  { %2122 = vmatpush3.bf16.msra.mxu0 %v2121_v9 }
 0x75b   :  { %2123 = vmatprep.subr.bf16.mxu0 %v2175_v8 }
 0x75e   :  { %2125 = vmatpush3.bf16.msra.mxu0 %v2124_v12 }
 0x75f   :  { %2126 = vmatprep.subr.bf16.mxu0 %v2175_v8 }
 0x762   :  { %2128 = vmatpush3.bf16.msra.mxu0 %v2127_v15 }
 0x763   :  { %2129 = vmatprep.subr.bf16.mxu0 %v2175_v8 }
 0x766   :  { %2131 = vmatpush3.bf16.msra.mxu0 %v2130_v18 }
 0x767   :  { %2132 = vmatprep.subr.bf16.mxu0 %v2175_v8 }
 0x76a   :  { %2134 = vmatpush3.bf16.msra.mxu0 %v2133_v27 }
 0x76b   :  { %2135 = vmatprep.subr.bf16.mxu0 %v2175_v8 }
 0x76e   :  { %2137 = vmatpush3.bf16.msra.mxu0 %v2136_v30 }
 0x824   :  { %v926_v21 = vpop.f32.mrb[8].mxu0 }
 0x825   :  { %v927_v22 = vadd.f32 %v1282_v20, %v926_v21  ;;  %v1803_v23 = vpop.f32.mrb[9].mxu0 }
 0x827   :  { %v930_v24 = vmax.f32 %v927_v22, 0.0 }
 0x829   :  { %1837 = vmatmul.mubr.f32.vlgmr.msra.gmra.mrb[8].mxu1 %v930_v24 }
 0x8fc   :  { %v1022_v32 = vpop.f32.mrb[8].mxu1 }
 0x8fd   :  { %v1023_v35 = vadd.f32 %v1300_v31, %v1022_v32  ;;  %v1838_v36 = vpop.f32.mrb[9].mxu1 }
 0x8ff   :  { %v1026_v8 = vadd.f32 %v1023_v35, %v546_v34 }
 0x901   :  { %v1027_v37 = vmax.f32 %v1026_v8, 0.0 }
 0x903   :  { %1872 = vmatmul.mubr.f32.vlgmr.msra.gmra.mrb[10].mxu0 %v1027_v37 }
 0x9d6   :  { %v1117_v6 = vpop.f32.mrb[10].mxu0 }
 0x9d7   :  { %v1118_v38 = vadd.f32 %v1301_v5, %v1117_v6  ;;  %v1873_v39 = vpop.f32.mrb[11].mxu0 }
 0x9d9   :  { %1122 = vst.msk [vmem:[#allocation2] sm:$0xff] %vm1121_vm1, %v1118_v38 }
 0x9da   :  { %2160 = shalt.err (!%p2157_p4)
}
 0x9db   :  { %s2161_s19 = scalar_lea.hbm %s2933_s7, 128 }
 0x9dc   :  { %p2162_p5 = scmp.ne.s32.totalorder %s2933_s7, %s2161_s19  ;;  %p2165_p6 = scmp.lt.u32.totalorder %s2161_s19, %s2933_s7 }
 0x9de   :  { %p2167_p7 = pnand %p2165_p6, %p2162_p5 }
 0x9e0   :  { %2170 = shalt.err (!%p2167_p7)
}
 0x9e1   :  { %1132 = dma.vmem_to_hbm [thread:$0]  %s1130_s5, 128, %s2933_s7, [#allocation3]  }
 0x9e2   :  { %2171 = dma.done.wait [#allocation3], 128  }
 0x9e3   :  { %2172 = vsyncadd [#allocation3], 4294967168 }
 0x9e4   :  { %1136 = vsyncpa [#allocation3], 1 }

</bundles_post_ra>
